<compile_context>
chip_gen: v6e
topology: v6e:2x2x1
jax: 0.10.0
libtpu: 0.0.40
codegen_flags: <defaults>
</compile_context>

<pallas_src>
import functools

import jax
import jax.numpy as jnp
from jax.experimental import pallas as pl
from jax.experimental.pallas import tpu as pltpu


def _softmax_and_output(score, v, attn_ref, out_ref):
    # Numerically stable softmax over the last dim.
    m = jnp.max(score, axis=-1, keepdims=True)
    e = jnp.exp(score - m)
    s = jnp.sum(e, axis=-1, keepdims=True)
    attn = e * pl.reciprocal(s, approx=True)          # EUP reciprocal + VPU mul
    attn_ref[0] = attn.astype(attn_ref.dtype)
    out_ref[0] = jnp.dot(attn.astype(v.dtype), v,
                         preferred_element_type=jnp.float32).astype(out_ref.dtype)


def _sdpa_kernel(q_ref, k_ref, v_ref, attn_ref, out_ref, *, inv_scale):
    q = q_ref[0] * inv_scale                          # (TQ, D), scale folded into q
    k = k_ref[0]                                      # (Lk, D)
    v = v_ref[0]                                      # (Lk, Dv)
    # score[i, j] = sum_d q[i, d] * k[j, d]  (contract feature dims; no k.T)
    score = jax.lax.dot_general(
        q, k, dimension_numbers=(((1,), (1,)), ((), ())),
        preferred_element_type=jnp.float32)           # (TQ, Lk) f32
    _softmax_and_output(score, v, attn_ref, out_ref)


def _sdpa_masked_kernel(q_ref, k_ref, v_ref, bias_ref, attn_ref, out_ref, *,
                        inv_scale):
    q = q_ref[0] * inv_scale
    k = k_ref[0]
    v = v_ref[0]
    score = jax.lax.dot_general(
        q, k, dimension_numbers=(((1,), (1,)), ((), ())),
        preferred_element_type=jnp.float32)
    # Additive bias: 0 where kept, -inf where masked (== masked_fill(mask, -inf)).
    score = score + bias_ref[0].astype(jnp.float32)
    _softmax_and_output(score, v, attn_ref, out_ref)


def _pick_q_tile(Lq, Lk, D, Dv, io_itemsize, mask_itemsize,
                 budget=24 * 1024 * 1024):
    """Largest q-tile (divisor of Lq, <=512) whose double-buffered working set
    fits comfortably under a 32 MiB scoped-VMEM budget (v7x-safe)."""
    def working_set(tq):
        per_step = 2 * tq * ((D + Dv) * io_itemsize       # q tile + out tile
                             + Lk * 4                     # f32 attn tile
                             + Lk * mask_itemsize)        # bias tile (if any)
        resident = 2 * Lk * (D + Dv) * io_itemsize        # K/V (double-buffered)
        return per_step + resident
    for tq in (512, 256, 128, 64, 32, 16, 8):
        if tq <= Lq and Lq % tq == 0 and working_set(tq) <= budget:
            return tq
    return Lq   # tiny or non-divisible Lq: one q-tile per batch element


def scaled_dot_product_attention(q, k, v, scale, mask=None, q_tile=None):
    """Pallas equivalent of ScaledDotProductAttention.forward.

    q: [B, Lq, D], k: [B, Lk, D], v: [B, Lk, Dv]
    mask: optional boolean [B, Lq, Lk] (True -> -inf before softmax)
    Returns (attn [B, Lq, Lk] float32, output [B, Lq, Dv]).
    """
    B, Lq, D = q.shape
    _, Lk, _ = k.shape
    Dv = v.shape[-1]
    io_itemsize = jnp.dtype(q.dtype).itemsize
    mask_itemsize = 2 if mask is not None else 0      # bf16 additive bias

    if q_tile is None:
        TQ = _pick_q_tile(Lq, Lk, D, Dv, io_itemsize, mask_itemsize)
    else:
        if Lq % q_tile != 0:
            raise ValueError(f"q_tile={q_tile} must divide Lq={Lq}")
        TQ = q_tile
    num_q = Lq // TQ

    grid = (B, num_q)
    q_spec = pl.BlockSpec((1, TQ, D), lambda b, i: (b, i, 0))
    # K/V index only on the batch axis -> resident across all q-tiles of a batch.
    k_spec = pl.BlockSpec((1, Lk, D), lambda b, i: (b, 0, 0))
    v_spec = pl.BlockSpec((1, Lk, Dv), lambda b, i: (b, 0, 0))
    attn_spec = pl.BlockSpec((1, TQ, Lk), lambda b, i: (b, i, 0))
    o_spec = pl.BlockSpec((1, TQ, Dv), lambda b, i: (b, i, 0))

    out_shape = (
        jax.ShapeDtypeStruct((B, Lq, Lk), jnp.float32),   # attn
        jax.ShapeDtypeStruct((B, Lq, Dv), q.dtype),       # output
    )

    bytes_accessed = ((q.size + k.size + v.size) * io_itemsize
                      + B * Lq * Lk * 4                   # attn write
                      + B * Lq * Dv * io_itemsize         # output write
                      + B * Lq * Lk * mask_itemsize)      # bias read
    cost = pl.CostEstimate(
        flops=2 * B * Lq * Lk * (D + Dv),
        transcendentals=B * Lq * Lk,
        bytes_accessed=bytes_accessed)

    cparams = pltpu.CompilerParams(
        dimension_semantics=("parallel", "parallel"),
        vmem_limit_bytes=32 * 1024 * 1024)                # safe on v5e/v6e/v7x

    inv_scale = 1.0 / float(scale)

    if mask is None:
        return pl.pallas_call(
            functools.partial(_sdpa_kernel, inv_scale=inv_scale),
            out_shape=out_shape,
            grid=grid,
            in_specs=[q_spec, k_spec, v_spec],
            out_specs=(attn_spec, o_spec),
            compiler_params=cparams,
            cost_estimate=cost,
        )(q, k, v)

    mask = jnp.broadcast_to(mask, (B, Lq, Lk))
    # Precompute the additive bias (0 keep, -inf masked) in bf16: halves the
    # mask HBM traffic vs int32 while keeping exact masked_fill(-inf) semantics.
    bias = jnp.where(mask, -jnp.inf, 0.0).astype(jnp.bfloat16)
    bias_spec = pl.BlockSpec((1, TQ, Lk), lambda b, i: (b, i, 0))
    return pl.pallas_call(
        functools.partial(_sdpa_masked_kernel, inv_scale=inv_scale),
        out_shape=out_shape,
        grid=grid,
        in_specs=[q_spec, k_spec, v_spec, bias_spec],
        out_specs=(attn_spec, o_spec),
        compiler_params=cparams,
        cost_estimate=cost,
    )(q, k, v, bias)


def _reference(q, k, v, scale, mask=None):
    score = jnp.einsum("bqd,bkd->bqk", q, k).astype(jnp.float32) / scale
    if mask is not None:
        score = jnp.where(mask, -jnp.inf, score)
    attn = jax.nn.softmax(score, axis=-1)
    out = jnp.einsum("bqk,bkd->bqd", attn, v.astype(jnp.float32))
    return attn, out.astype(q.dtype)


if __name__ == "__main__":
    key = jax.random.PRNGKey(0)
    kq, kk, kv, km = jax.random.split(key, 4)

    B, Lq, Lk, D = 2, 16, 16, 32
    scale = float(D) ** 0.5

    q = jax.random.normal(kq, (B, Lq, D), dtype=jnp.float32)
    k = jax.random.normal(kk, (B, Lk, D), dtype=jnp.float32)
    v = jax.random.normal(kv, (B, Lk, D), dtype=jnp.float32)

    TOL = dict(atol=5e-3, rtol=5e-3)   # approx reciprocal in the softmax denom

    # No-mask path, auto q-tile (single q-tile per batch at this size).
    attn, out = scaled_dot_product_attention(q, k, v, scale)
    jax.block_until_ready((attn, out))
    attn_ref, out_ref = _reference(q, k, v, scale)
    assert jnp.allclose(attn, attn_ref, **TOL)
    assert jnp.allclose(out, out_ref, **TOL)

    # No-mask path, forced q_tile=8 -> 2-D grid (B, 2); K/V resident per batch.
    attn_t, out_t = scaled_dot_product_attention(q, k, v, scale, q_tile=8)
    jax.block_until_ready((attn_t, out_t))
    assert jnp.allclose(attn_t, attn_ref, **TOL)
    assert jnp.allclose(out_t, out_ref, **TOL)

    # Masked path (True -> -inf before softmax), with q-tiling.
    mask = jax.random.bernoulli(km, 0.25, (B, Lq, Lk))
    attn_m, out_m = scaled_dot_product_attention(q, k, v, scale, mask=mask,
                                                 q_tile=8)
    jax.block_until_ready((attn_m, out_m))
    attn_m_ref, out_m_ref = _reference(q, k, v, scale, mask=mask)
    assert jnp.allclose(attn_m, attn_m_ref, **TOL)
    assert jnp.allclose(out_m, out_m_ref, **TOL)

    print("KERNEL_OK")
</pallas_src>

<mosaic_0001>
module attributes {stable_mosaic.version = 11 : i64} {
  func.func @_sdpa_kernel(%arg0: i32, %arg1: i32, %arg2: memref<1x16x32xf32, #tpu.memory_space<vmem>>, %arg3: memref<1x16x32xf32, #tpu.memory_space<vmem>>, %arg4: memref<1x16x32xf32, #tpu.memory_space<vmem>>, %arg5: memref<1x16x16xf32, #tpu.memory_space<vmem>>, %arg6: memref<1x16x32xf32, #tpu.memory_space<vmem>>) attributes {dimension_semantics = [#tpu.dimension_semantics<parallel>, #tpu.dimension_semantics<parallel>], iteration_bounds = array<i64: 2, 1>, scalar_prefetch = 0 : i64, scratch_operands = 0 : i64, tpu.core_type = #tpu.core_type<tc>, window_params = [{transform_indices = @transform_0, window_bounds = array<i64: 1, 16, 32>}, {transform_indices = @transform_1, window_bounds = array<i64: 1, 16, 32>}, {transform_indices = @transform_2, window_bounds = array<i64: 1, 16, 32>}, {transform_indices = @transform_3, window_bounds = array<i64: 1, 16, 16>}, {transform_indices = @transform_4, window_bounds = array<i64: 1, 16, 32>}]} {
    %c0 = arith.constant 0 : index
    %c0_0 = arith.constant 0 : index
    %c0_1 = arith.constant 0 : index
    %0 = vector.load %arg2[%c0, %c0_0, %c0_1] : memref<1x16x32xf32, #tpu.memory_space<vmem>>, vector<1x16x32xf32>
    %1 = vector.shape_cast %0 : vector<1x16x32xf32> to vector<16x32xf32>
    %cst = arith.constant 0.176776692 : f32
    %2 = vector.broadcast %cst : f32 to vector<16x32xf32>
    %3 = arith.mulf %1, %2 : vector<16x32xf32>
    %c0_2 = arith.constant 0 : index
    %c0_3 = arith.constant 0 : index
    %c0_4 = arith.constant 0 : index
    %4 = vector.load %arg3[%c0_2, %c0_3, %c0_4] : memref<1x16x32xf32, #tpu.memory_space<vmem>>, vector<1x16x32xf32>
    %5 = vector.shape_cast %4 : vector<1x16x32xf32> to vector<16x32xf32>
    %c0_5 = arith.constant 0 : index
    %c0_6 = arith.constant 0 : index
    %c0_7 = arith.constant 0 : index
    %6 = vector.load %arg4[%c0_5, %c0_6, %c0_7] : memref<1x16x32xf32, #tpu.memory_space<vmem>>, vector<1x16x32xf32>
    %7 = vector.shape_cast %6 : vector<1x16x32xf32> to vector<16x32xf32>
    %cst_8 = arith.constant dense<0.000000e+00> : vector<16x16xf32>
    %8 = tpu.matmul %3, %5, %cst_8 {dimension_numbers = #tpu.dot_dimension_numbers<[1], [1], [0], [0], [0, 0, 1, 0], [], []>} : vector<16x32xf32>, vector<16x32xf32>, vector<16x16xf32> -> vector<16x16xf32>
    %cst_9 = arith.constant dense<0xFF800000> : vector<16xf32>
    %9 = vector.multi_reduction <maximumf>, %8, %cst_9 [1] : vector<16x16xf32> to vector<16xf32>
    %10 = vector.shape_cast %9 : vector<16xf32> to vector<16x1xf32>
    %11 = vector.broadcast %10 : vector<16x1xf32> to vector<16x16xf32>
    %12 = arith.subf %8, %11 : vector<16x16xf32>
    %13 = math.exp %12 : vector<16x16xf32>
    %cst_10 = arith.constant dense<0.000000e+00> : vector<16xf32>
    %14 = vector.multi_reduction <add>, %13, %cst_10 [1] : vector<16x16xf32> to vector<16xf32>
    %15 = vector.shape_cast %14 : vector<16xf32> to vector<16x1xf32>
    %16 = tpu.reciprocal %15 {approx = true} : vector<16x1xf32> -> vector<16x1xf32>
    %17 = vector.broadcast %16 : vector<16x1xf32> to vector<16x16xf32>
    %18 = arith.mulf %13, %17 : vector<16x16xf32>
    %c0_11 = arith.constant 0 : index
    %c0_12 = arith.constant 0 : index
    %c0_13 = arith.constant 0 : index
    %19 = vector.load %arg5[%c0_11, %c0_12, %c0_13] : memref<1x16x16xf32, #tpu.memory_space<vmem>>, vector<1x16x16xf32>
    %20 = vector.shape_cast %19 : vector<1x16x16xf32> to vector<16x16xf32>
    %21 = vector.shape_cast %18 : vector<16x16xf32> to vector<1x16x16xf32>
    tpu.vector_store %arg5[%c0_11, %c0_12, %c0_13], %21 {strides = array<i32>} : memref<1x16x16xf32, #tpu.memory_space<vmem>>, vector<1x16x16xf32>,
    %cst_14 = arith.constant dense<0.000000e+00> : vector<16x32xf32>
    %22 = tpu.matmul %18, %7, %cst_14 {dimension_numbers = #tpu.dot_dimension_numbers<[1], [0], [0], [1], [0, 0, 1, 1], [], []>} : vector<16x16xf32>, vector<16x32xf32>, vector<16x32xf32> -> vector<16x32xf32>
    %c0_15 = arith.constant 0 : index
    %c0_16 = arith.constant 0 : index
    %c0_17 = arith.constant 0 : index
    %23 = vector.load %arg6[%c0_15, %c0_16, %c0_17] : memref<1x16x32xf32, #tpu.memory_space<vmem>>, vector<1x16x32xf32>
    %24 = vector.shape_cast %23 : vector<1x16x32xf32> to vector<16x32xf32>
    %25 = vector.shape_cast %22 : vector<16x32xf32> to vector<1x16x32xf32>
    tpu.vector_store %arg6[%c0_15, %c0_16, %c0_17], %25 {strides = array<i32>} : memref<1x16x32xf32, #tpu.memory_space<vmem>>, vector<1x16x32xf32>,
    return
  }
  func.func @transform_0(%arg0: i32, %arg1: i32) -> (i32, i32, i32) {
    %c0_i32 = arith.constant 0 : i32
    %c0_i32_0 = arith.constant 0 : i32
    return %arg0, %arg1, %c0_i32 : i32, i32, i32
  }
  func.func @transform_1(%arg0: i32, %arg1: i32) -> (i32, i32, i32) {
    %c0_i32 = arith.constant 0 : i32
    %c0_i32_0 = arith.constant 0 : i32
    %c0_i32_1 = arith.constant 0 : i32
    return %arg0, %c0_i32, %c0_i32_0 : i32, i32, i32
  }
  func.func @transform_2(%arg0: i32, %arg1: i32) -> (i32, i32, i32) {
    %c0_i32 = arith.constant 0 : i32
    %c0_i32_0 = arith.constant 0 : i32
    %c0_i32_1 = arith.constant 0 : i32
    return %arg0, %c0_i32, %c0_i32_0 : i32, i32, i32
  }
  func.func @transform_3(%arg0: i32, %arg1: i32) -> (i32, i32, i32) {
    %c0_i32 = arith.constant 0 : i32
    %c0_i32_0 = arith.constant 0 : i32
    return %arg0, %arg1, %c0_i32 : i32, i32, i32
  }
  func.func @transform_4(%arg0: i32, %arg1: i32) -> (i32, i32, i32) {
    %c0_i32 = arith.constant 0 : i32
    %c0_i32_0 = arith.constant 0 : i32
    return %arg0, %arg1, %c0_i32 : i32, i32, i32
  }
}

</mosaic_0001>

<bundles_post_ra>
// kernel: tpu_custom_call.1
= control target key start
LH: loop header
LB: loop body
LE: loop exit
PB: predicated region body
PF: predicated region fallthrough
CT: control target
= control target key end

     0   :  { %s1394_s0 = inlined_call_operand.hbm [shape: f32[2,16,32], index: 0, kind: input, shape index: {}]   ;;  %s1395_s1 = inlined_call_operand.hbm [shape: f32[2,16,32], index: 1, kind: input, shape index: {}]   ;;  %s1396_s2 = inlined_call_operand.hbm [shape: f32[2,16,32], index: 2, kind: input, shape index: {}]   ;;  %s1397_s3 = inlined_call_operand.hbm [shape: f32[2,16,16], index: 3, kind: output, shape index: {0}]   ;;  %s1398_s4 = inlined_call_operand.hbm [shape: f32[2,16,32], index: 4, kind: output, shape index: {1}]  }
   0x1   :  { %1405 = sst [smem:[#allocation19_spill]] %s1395_s1 }
   0x2   :  { %10 = vsyncpa [#allocation3], 0 }
   0x3   :  { %12 = vsyncpa [#allocation3 + $0x1], 0 }
   0x4   :  { %13 = vsyncpa [#allocation6], 0 }
   0x5   :  { %15 = vsyncpa [#allocation6 + $0x1], 0 }
   0x6   :  { %16 = vsyncpa [#allocation4], 0 }
   0x7   :  { %18 = vsyncpa [#allocation4 + $0x1], 0 }
   0x8   :  { %19 = vsyncpa [#allocation10], 0 }
   0x9   :  { %21 = vsyncpa [#allocation10 + $0x1], 0  ;;  %s1118_s15 = smov 0   ;;  %s1120_s16 = smov 0  }
   0xa   :  { %s1122_s17 = smov 0   ;;  %s1124_s18 = smov 0  }
   0xb   :  { %s1126_s19 = smov 0   ;;  %s1128_s20 = smov 0  }
   0xc LB: > { %1406 = sst [smem:[#allocation15_spill]] %s1078_s19  ;;  %s1149_s21 = sadd.s32 4294967295, %s1082_s20   ;;  %s1082_s20 = sphi %s1128_s20, %s27_s20   ;;  %s1078_s19 = sphi %s1126_s19, %s1423_s19   ;;  %s1074_s18 = sphi %s1124_s18, %s1422_s18   ;;  %s1070_s17 = sphi %s1122_s17, %s1426_s17   ;;  %s1066_s16 = sphi %s1120_s16, %s1425_s16   ;;  %s1062_s15 = sphi %s1118_s15, %s1424_s15  }
   0xd   : > { %s736_s22 = sadd.s32 4294967294, %s1082_s20   ;;  %s39_s23 = sadd.s32 1, %s1078_s19 }
   0xe   : > { %s48_s24 = sadd.s32 1, %s1070_s17  ;;  %p41_p0 = scmp.ge.s32.totalorder %s39_s23, 2 }
   0xf   : > { %p55_p1 = scmp.ne.s32.totalorder %s1070_s17, %s1066_s16  ;;  %p56_p2 = scmp.eq.s32.totalorder %s1082_s20, 0 }
  0x10   : > { %p61_p3 = scmp.ne.s32.totalorder %s1066_s16, %s1062_s15  ;;  %s1428_s23 = smov (%p41_p0, %s39_s23), 0 }
  0x11   : > { %1407 = sst [smem:[#allocation16_spill]] %s1428_s23  ;;  %p1161_p4 = por %p56_p2, %p55_p1 }
  0x12   : > { %p62_p5 = scmp.eq.s32.totalorder %s1149_s21, 0  ;;  %s43_s26 = ssub.s32 %s1078_s19, %s1428_s23 }
  0x13   : > { %p139_p6 = scmp.eq.s32.totalorder %s1149_s21, 1  ;;  %p46_p7 = scmp.eq.s32.totalorder %s43_s26, 0 }
  0x14   : > { %p1169_p8 = por %p62_p5, %p61_p3  ;;  %p145_p10 = scmp.eq.s32.totalorder %s736_s22, 1 }
  0x15   : > { %p1173_p9 = por %p139_p6, %p55_p1  ;;  %p822_p13 = scmp.lt.s32.totalorder %s1082_s20, 2 }
  0x16   : > { %s1178_s29 = scalar_select %p46_p7, %s1070_s17, %s48_s24  }
  0x17   : > { %p1180_p11 = por %p145_p10, %p61_p3  ;;  %s1399_s5 = sand.u32 1, %s1070_s17  }
  0x18   : > { %1411 = sst [smem:[#allocation17_spill]] %s1178_s29  ;;  %s1189_s6 = sshll.u32 %s1399_s5, 4 }
  0x19   : > { %s1412_s30 = scalar_select %p1180_p11, 1, 0 }
  0x1a   : > { %s1192_s7 = sshll.u32 %s1078_s19, 8  ;;  %p1196_p0 = pnand %p822_p13, %p1161_p4 }
  0x1b   : > { %1413 = sst [smem:[#allocation18_spill]] %s1412_s30  ;;  %s216_s9 = sand.u32 1, %s1082_s20  }
  0x1c   : > { %s1415_s1 = sld [smem:[#allocation19_spill]]  ;;  %s220_s13 = scalar_lea.vmem [#allocation5], %s1189_s6 }
  0x1d   : > { %s227_s14 = sshll.u32 %s220_s13, 4  ;;  %p748_p1 = scmp.ge.s32.totalorder %s1082_s20, 1  ;;  %s228_s14 = int_to_ptr.vmem [resolvable:$true] %s227_s14 }
  0x1e   : > { %p256_p2 = scmp.lt.s32.totalorder %s1082_s20, 3  ;;  %s1208_s22 = scalar_lea.sflag [#allocation6], %s216_s9 }
  0x1f   : > { %p886_p3 = pneg %p1196_p0  ;;  %s897_s24 = scalar_lea.vmem %s228_s14, 256 }
  0x20   : > { %p898_p4 = scmp.ne.s32.totalorder %s228_s14, %s897_s24  ;;  %s1084_s25 = smov [#allocation5]  }
  0x21   : > { %s902_s26 = sshll.u32 %s1084_s25, 4  ;;  %s903_s26 = int_to_ptr.vmem [resolvable:$false] %s902_s26 }
  0x22   : > { %s226_s12 = scalar_lea.hbm %s1415_s1, %s1192_s7  ;;  %p900_p5 = pnand %p898_p4, %p886_p3 }
  0x23   : > { %s904_s10 = scalar_lea.vmem %s903_s26, 512  ;;  %p905_p7 = scmp.lt.s32.totalorder %s228_s14, %s903_s26 }
  0x24   : > { %p901_p6 = pneg %p900_p5  ;;  %p906_p10 = scmp.lt.s32.totalorder %s904_s10, %s897_s24 }
  0x26   : > { %p907_p13 = por %p906_p10, %p905_p7 }
  0x28   : > { %p908_p12 = pnand %p907_p13, %p901_p6 }
  0x2a   : > { %911 = shalt.err (!%p908_p12)
}
  0x2b   : > { %s1403_s11 = smov 128   ;;  %s1086_s9 = smov 8  }
  0x2c   : > { %811 = dma.hbm_to_vmem [thread:$0]  (!%p1196_p0), %s226_s12, 256, %s228_s14, %s1208_s22, %s1403_s11, %s1403_s11, %s1086_s9  }
  0x2d   : > { %p1225_p4 = pnand %p748_p1, %p256_p2  ;;  %s205_s26 = scalar_lea.hbm %s1394_s0, %s1192_s7 }
  0x2e   : > { %s197_s10 = scalar_lea.vmem [#allocation2], %s1189_s6  ;;  %s247_s19 = scalar_lea.hbm %s1396_s2, %s1192_s7 }
  0x2f   : > { %s206_s5 = sshll.u32 %s197_s10, 4  ;;  %s1417_s29 = sand.u32 1, %s1070_s17   ;;  %s207_s5 = int_to_ptr.vmem [resolvable:$true] %s206_s5 }
  0x30   : > { %s194_s30 = scalar_lea.sflag [#allocation3], %s1417_s29  ;;  %s925_s12 = scalar_lea.vmem %s207_s5, 256 }
  0x31   : > { %p926_p12 = scmp.ne.s32.totalorder %s207_s5, %s925_s12  ;;  %s1087_s14 = smov [#allocation2]  }
  0x32   : > { %s930_s11 = sshll.u32 %s1087_s14, 4  ;;  %s931_s11 = int_to_ptr.vmem [resolvable:$false] %s930_s11 }
  0x33   : > { %p928_p1 = pnand %p926_p12, %p886_p3  ;;  %s932_s24 = scalar_lea.vmem %s931_s11, 512 }
  0x34   : > { %p933_p5 = scmp.lt.s32.totalorder %s207_s5, %s931_s11  ;;  %p934_p6 = scmp.lt.s32.totalorder %s932_s24, %s925_s12 }
  0x35   : > { %p929_p2 = pneg %p928_p1 }
  0x36   : > { %p935_p7 = por %p934_p6, %p933_p5 }
  0x38   : > { %p936_p10 = pnand %p935_p7, %p929_p2 }
  0x3a   : > { %939 = shalt.err (!%p936_p10)
}
  0x3b   : > { %s1418_s1 = smov 128   ;;  %s241_s23 = scalar_lea.vmem [#allocation7], %s1189_s6 }
  0x3c   : > { %808 = dma.hbm_to_vmem [thread:$0]  (!%p1196_p0), %s205_s26, 256, %s207_s5, %s194_s30, %s1418_s1, %s1418_s1, %s1086_s9  }
  0x3d   : > { %s248_s29 = sshll.u32 %s241_s23, 4  ;;  %s1088_s11 = smov [#allocation7]   ;;  %s249_s29 = int_to_ptr.vmem [resolvable:$true] %s248_s29 }
  0x3e   : > { %s953_s25 = scalar_lea.vmem %s249_s29, 256  ;;  %s958_s10 = sshll.u32 %s1088_s11, 4  ;;  %s959_s10 = int_to_ptr.vmem [resolvable:$false] %s958_s10 }
  0x3f   : > { %p954_p13 = scmp.ne.s32.totalorder %s249_s29, %s953_s25  ;;  %s960_s12 = scalar_lea.vmem %s959_s10, 512 }
  0x40   : > { %p961_p2 = scmp.lt.s32.totalorder %s249_s29, %s959_s10  ;;  %p962_p5 = scmp.lt.s32.totalorder %s960_s12, %s953_s25 }
  0x41   : > { %p956_p12 = pnand %p954_p13, %p886_p3 }
  0x42   : > { %p963_p6 = por %p962_p5, %p961_p2 }
  0x43   : > { %p957_p1 = pneg %p956_p12 }
  0x45   : > { %p964_p7 = pnand %p963_p6, %p957_p1 }
  0x47   : > { %967 = shalt.err (!%p964_p7)
}
  0x48   : > { %814 = dma.hbm_to_vmem [thread:$0]  (!%p1196_p0), %s247_s19, 256, %s249_s29, %s1208_s22, %s1418_s1, %s1418_s1, %s1086_s9  }
  0x49   : > { %260 = sbr.rel (%p1225_p4) target bundleno = 810 (0x32a), region = 32  ;;  %s1266_s6 = sand.u32 (!%p1225_p4), 1, %s1066_s16  }
  0x4a   : > { %s1269_s8 = sshll.u32 (!%p1225_p4), %s1266_s6, 4  ;;  %s263_s26 = scalar_lea.sflag (!%p1225_p4), [#allocation3], %s1266_s6 }
  0x4b   : > { %s266_s14 = scalar_lea.vmem (!%p1225_p4), [#allocation2], %s1269_s8 }
  0x4e   : > { %1045 = dma.done.wait (%p1169_p8), %s263_s26, 256  }
  0x4f   : > { %1047 = vsyncadd (%p1169_p8), %s263_s26, 4294967040  ;;  %s271_s19 = sand.u32 1, %s1149_s21   ;;  %s275_s22 = scalar_lea.vmem [#allocation5], %s1269_s8 }
  0x50   : > { %s272_s7 = scalar_lea.sflag [#allocation6], %s271_s19 }
  0x51   : > { %1049 = dma.done.wait (%p1169_p8), %s272_s7, 512  }
  0x52   : > { %1051 = vsyncadd (%p1169_p8), %s272_s7, 4294966784  ;;  %vm335_vm0 = vcmask 261120   ;;  %v332_v0 = vld [vmem:[%s275_s22 + $0x8] sm:$0xff]  ;;  %v331_v1 = vld [vmem:[%s275_s22] sm:$0xff]  ;;  %vm423_vm1 = vcmask 130048   ;;  %s284_s21 = scalar_lea.vmem [#allocation7], %s1269_s8 }
  0x53   : > { %v327_v2 = vld [vmem:[%s266_s14] sm:$0xff]  ;;  %781 = vmatprep.subr.msk.mxu0 %vm335_vm0, %v332_v0  ;;  %v328_v4 = vld [vmem:[%s266_s14 + $0x8] sm:$0xff]  ;;  %s316_s27 = scalar_lea.vmem [#allocation8], %s1269_s8  ;;  %s771_s9 = sshll.u32 %s1074_s18, 8 }
  0x54   : > { %v329_v3 = vmul.f32 0.17677669, %v327_v2  ;;  %782 = vmatpush3.xpose.msk.msra.mxu0 %vm335_vm0, %v332_v0  ;;  %v330_v5 = vmul.f32 0.17677669, %v328_v4  ;;  %v334_v20 = vld [vmem:[%s284_s21 + $0x8] sm:$0xff]  ;;  %v333_v21 = vld [vmem:[%s284_s21] sm:$0xff]  ;;  %s1305_s1 = scalar_lea.hbm %s1397_s3, %s771_s9 }
  0x55   : > { %783 = vmatprep.subr.msk.mxu0 %vm335_vm0, %v331_v1  ;;  %788 = vmatprep.subr.mxu1 %v334_v20  ;;  %s552_s23 = sshll.u32 %s316_s27, 4  ;;  %s532_s29 = scalar_lea.sflag [#allocation4], %s1266_s6  ;;  %s1307_s23 = int_to_ptr.vmem [resolvable:$true] %s552_s23 }
  0x56   : > { %785 = vmatprep.mubr.msk.f32.mxu0 %vm335_vm0, %v329_v3  ;;  %789 = vmatpush3.msra.mxu1 %v334_v20  ;;  %s968_s25 = scalar_lea.vmem %s1307_s23, 256  ;;  %s1089_s11 = smov [#allocation8]  }
  0x57   : > { %790 = vmatprep.subr.mxu1 %v333_v21  ;;  %p969_p8 = scmp.ne.s32.totalorder %s1307_s23, %s968_s25  ;;  %s972_s10 = sshll.u32 %s1089_s11, 4  ;;  %s973_s10 = int_to_ptr.vmem [resolvable:$false] %s972_s10 }
  0x58   : > { %784 = vmatpush3.xpose.msk.msra.mxu0 %vm335_vm0, %v331_v1  ;;  %791 = vmatpush3.msra.mxu1 %v333_v21  ;;  %s974_s12 = scalar_lea.vmem %s973_s10, 512  ;;  %p975_p4 = scmp.lt.s32.totalorder %s1307_s23, %s973_s10 }
  0x59   : > { %p970_p0 = pnand %p969_p8, %p1173_p9  ;;  %p976_p10 = scmp.lt.s32.totalorder %s974_s12, %s968_s25 }
  0x5b   : > { %786 = vmatmul.mubr.msk.f32.vlgmr.msra.gmra.mxu0 %vm335_vm0, %v330_v5  ;;  %p971_p3 = pneg %p970_p0  ;;  %p977_p13 = por %p976_p10, %p975_p4 }
  0x5d   : > { %p978_p12 = pnand %p977_p13, %p971_p3 }
 0x11b   : > { %v787_v6 = vpop.f32.mrf.mxu0 }
 0x11c   : > { %v427_v9 = vsel %vm423_vm1, %v787_v6, -inf }
 0x11d   : > { %v414_v7 = vpop.f32.mrf.mxu0 }
 0x11e   : > { %v424_v8 = vsel %vm423_vm1, %v414_v7, -inf }
 0x11f   : > { %425 = vmax.xlane.f32.xlu0 %v424_v8 }
 0x123   : > { %428 = vmax.xlane.f32.xlu0 %v427_v9 }
 0x1a8   : > { %v426_v10 = vpop.xlane.xlu0 %425 }
 0x1a9   : > { %v430_v11 = vsub.f32 %v414_v7, %v426_v10 }
 0x1ab   : > { %v432_v12 = vmul.f32 1.442695, %v430_v11 }
 0x1ac   : > { %v429_v13 = vpop.xlane.xlu0 %428 }
 0x1ad   : > { %876 = vpow2.f32 %v432_v12  ;;  %v431_v14 = vsub.f32 %v787_v6, %v429_v13 }
 0x1af   : > { %v434_v15 = vmul.f32 1.442695, %v431_v14 }
 0x1b1   : > { %878 = vpow2.f32 %v434_v15 }
 0x1ba   : > { %v877_v16 = vpop.eup %876 }
 0x1bb   : > { %v436_v17 = vsel %vm423_vm1, %v877_v16, 0.0 }
 0x1bc   : > { %437 = vadd.xlane.f32.xlu1 %v436_v17 }
 0x1be   : > { %v879_v18 = vpop.eup %878 }
 0x1bf   : > { %v439_v19 = vsel %vm423_vm1, %v879_v18, 0.0 }
 0x1c0   : > { %440 = vadd.xlane.f32.xlu1 %v439_v19 }
 0x245   : > { %v438_v22 = vpop.xlane.xlu1 %437 }
 0x246   : > { %880 = vrcp.f32 %v438_v22 }
 0x249   : > { %v441_v23 = vpop.xlane.xlu1 %440 }
 0x24a   : > { %882 = vrcp.f32 %v441_v23 }
 0x253   : > { %v881_v24 = vpop.eup %880 }
 0x254   : > { %v444_v25 = vmul.f32 %v881_v24, %v877_v16 }
 0x256   : > { %446 = vst.msk [vmem:[%s316_s27] sm:$0xff] %vm423_vm1, %v444_v25  ;;  %792 = vmatprep.mubr.msk.f32.mxu1 %vm423_vm1, %v444_v25 }
 0x257   : > { %v883_v26 = vpop.eup %882 }
 0x258   : > { %v445_v27 = vmul.f32 %v883_v26, %v879_v18 }
 0x25a   : > { %793 = vmatmul.mubr.msk.f32.vlgmr.msra.gmra.mxu1 %vm423_vm1, %v445_v27  ;;  %447 = vst.msk [vmem:[%s316_s27 + $0x8] sm:$0xff] %vm423_vm1, %v445_v27 }
 0x25b   : > { %981 = shalt.err (!%p978_p12)
}
 0x25c   : > { %s982_s30 = scalar_lea.hbm %s1305_s1, 256  ;;  %s986_s14 = scalar_lea.hbm %s1397_s3, 512 }
 0x25d   : > { %p983_p1 = scmp.ne.s32.totalorder %s1305_s1, %s982_s30  ;;  %p987_p6 = scmp.lt.s32.totalorder %s1305_s1, %s1397_s3 }
 0x25e   : > { %p988_p7 = scmp.lt.s32.totalorder %s986_s14, %s982_s30 }
 0x25f   : > { %p984_p2 = pnand %p983_p1, %p1173_p9 }
 0x260   : > { %p989_p8 = por %p988_p7, %p987_p6 }
 0x261   : > { %p985_p5 = pneg %p984_p2 }
 0x263   : > { %p990_p0 = pnand %p989_p8, %p985_p5 }
 0x265   : > { %993 = shalt.err (!%p990_p0)
}
 0x266   : > { %s1090_s22 = smov 128   ;;  %s1091_s21 = smov 8  }
 0x267   : > { %801 = dma.vmem_to_hbm [thread:$0]  (%p1173_p9), %s1307_s23, 256, %s1305_s1, %s532_s29, %s1090_s22, %s1090_s22, %s1091_s21  }
 0x268   : > { %s323_s27 = scalar_lea.vmem [#allocation9], %s1269_s8  ;;  %s1344_s11 = scalar_lea.hbm %s1398_s4, %s771_s9 }
 0x269   : > { %s570_s13 = sshll.u32 %s323_s27, 4  ;;  %s537_s1 = scalar_lea.sflag [#allocation10], %s1266_s6  ;;  %s1336_s13 = int_to_ptr.vmem [resolvable:$true] %s570_s13 }
 0x26a   : > { %s994_s8 = scalar_lea.vmem %s1336_s13, 256  ;;  %s1092_s23 = smov [#allocation9]  }
 0x26b   : > { %p995_p3 = scmp.ne.s32.totalorder %s1336_s13, %s994_s8  ;;  %s998_s29 = sshll.u32 %s1092_s23, 4  ;;  %s999_s29 = int_to_ptr.vmem [resolvable:$false] %s998_s29 }
 0x26c   : > { %s1000_s10 = scalar_lea.vmem %s999_s29, 512  ;;  %p1001_p13 = scmp.lt.s32.totalorder %s1336_s13, %s999_s29 }
 0x26d   : > { %p996_p4 = pnand %p995_p3, %p1173_p9  ;;  %p1002_p12 = scmp.lt.s32.totalorder %s1000_s10, %s994_s8 }
 0x26f   : > { %p997_p10 = pneg %p996_p4  ;;  %p1003_p1 = por %p1002_p12, %p1001_p13 }
 0x271   : > { %p1004_p2 = pnand %p1003_p1, %p997_p10 }
 0x31a   : > { %v794_v28 = vpop.f32.mrf.mxu1 }
 0x31b   : > { %530 = vst.msk [vmem:[%s323_s27 + $0x8] sm:$0xff] %vm335_vm0, %v794_v28 }
 0x31c   : > { %v520_v29 = vpop.f32.mrf.mxu1 }
 0x31d   : > { %529 = vst.msk [vmem:[%s323_s27] sm:$0xff] %vm335_vm0, %v520_v29 }
 0x31e   : > { %1007 = shalt.err (!%p1004_p2)
}
 0x31f   : > { %s1008_s18 = scalar_lea.hbm %s1344_s11, 256  ;;  %s1012_s12 = scalar_lea.hbm %s1398_s4, 512 }
 0x320   : > { %p1009_p5 = scmp.ne.s32.totalorder %s1344_s11, %s1008_s18  ;;  %p1013_p8 = scmp.lt.s32.totalorder %s1344_s11, %s1398_s4 }
 0x321   : > { %p1014_p0 = scmp.lt.s32.totalorder %s1012_s12, %s1008_s18 }
 0x322   : > { %p1010_p6 = pnand %p1009_p5, %p1173_p9 }
 0x323   : > { %p1015_p3 = por %p1014_p0, %p1013_p8 }
 0x324   : > { %p1011_p7 = pneg %p1010_p6 }
 0x326   : > { %p1016_p4 = pnand %p1015_p3, %p1011_p7 }
 0x328   : > { %1019 = shalt.err (!%p1016_p4)
}
 0x329   : > { %802 = dma.vmem_to_hbm [thread:$0]  (%p1173_p9), %s1336_s13, 256, %s1344_s11, %s537_s1, %s1090_s22, %s1090_s22, %s1091_s21  }
 0x32a PF: > { %s585_s14 = sand.u32 1, %s1062_s15   ;;  %p1420_p10 = scmp.ge.s32.totalorder %s1082_s20, 2 }
 0x32b   : > { %s586_s19 = scalar_lea.sflag [#allocation4], %s585_s14 }
 0x32c   : > { %p816_p13 = pnand %p1420_p10, %p1180_p11 }
 0x32e   : > { %p817_p12 = pneg %p816_p13 }
 0x330   : > { %1053 = dma.done.wait (%p817_p12), %s586_s19, 256  }
 0x331   : > { %1055 = vsyncadd (%p817_p12), %s586_s19, 4294967040  ;;  %s595_s7 = scalar_lea.sflag [#allocation10], %s585_s14 }
 0x332   : > { %1057 = dma.done.wait (%p817_p12), %s595_s7, 256  }
 0x333   : > { %1059 = vsyncadd (%p817_p12), %s595_s7, 4294967040  ;;  %s27_s20 = sadd.s32 1, %s1082_s20   ;;  %s1421_s28 = sld [smem:[#allocation17_spill]] }
 0x334   : > { %p24_p1 = scmp.ge.s32.totalorder %s27_s20, 4   ;;  %s1422_s18 = sld [smem:[#allocation15_spill]] }
 0x335   : > { %s1423_s19 = sld [smem:[#allocation16_spill]]  ;;  %s1424_s15 = smov %s1066_s16 }
 0x336   : > { %s1425_s16 = smov %s1070_s17  ;;  %26 = sbr.rel (!%p24_p1) target bundleno = 12 (0xc), region = 118 }
 0x339   : > { %s1426_s17 = smov %s1421_s28 }
 0x33b   :  { %600 = vsyncpa [#allocation3], 1 }
 0x33c   :  { %602 = vsyncpa [#allocation3 + $0x1], 1 }
 0x33d   :  { %603 = vsyncpa [#allocation6], 1 }
 0x33e   :  { %605 = vsyncpa [#allocation6 + $0x1], 1 }
 0x33f   :  { %606 = vsyncpa [#allocation4], 1 }
 0x340   :  { %608 = vsyncpa [#allocation4 + $0x1], 1 }
 0x341   :  { %609 = vsyncpa [#allocation10], 1 }
 0x342   :  { %611 = vsyncpa [#allocation10 + $0x1], 1 }

</bundles_post_ra>
